<compile_context>
chip_gen: v7x
topology: tpu7x:2x2x1
jax: 0.10.0
libtpu: 0.0.40
codegen_flags: <defaults>
</compile_context>

<pallas_src>
import functools

import jax
import jax.numpy as jnp
import numpy as np
from jax.experimental import pallas as pl
from jax.experimental.pallas import tpu as pltpu


def _prelu(x, a):
    return jnp.maximum(x, 0.0) + a * jnp.minimum(x, 0.0)


def _im2col_3x3(x_flat, width):
    """Build the (9*C, H*W) im2col patch matrix of a 3x3 'same' conv.

    x_flat: (C, H*W) channel-major flattened image (row-major H, W).
    Entirely value-level (vregs): one lane-axis concat for the H zero padding,
    9 static shifted slices, and a W-edge mask for the shifted columns.
    """
    c, hw = x_flat.shape
    w = width
    zpad = jnp.zeros((c, w + 1), jnp.float32)
    xp = jnp.concatenate([zpad, x_flat, zpad], axis=1)       # (C, HW + 2W + 2)
    col = jax.lax.broadcasted_iota(jnp.int32, (1, hw), 1) % w
    left_edge = col == 0                                     # no (w-1) neighbour
    right_edge = col == (w - 1)                              # no (w+1) neighbour
    taps = []
    for dy in range(3):
        for dx in range(3):
            s = dy * w + dx
            t = xp[:, s:s + hw]                              # (C, HW)
            if dx == 0:
                t = jnp.where(left_edge, 0.0, t)
            elif dx == 2:
                t = jnp.where(right_edge, 0.0, t)
            taps.append(t)
    return jnp.concatenate(taps, axis=0)                     # (9*C, HW)


def block_kernel(x_ref, w1_ref, b1_ref, a1_ref, w2_ref, b2_ref, *rest,
                 width, has_projection):
    if has_projection:
        wsc_ref, bsc_ref, aout_ref, o_ref = rest
    else:
        aout_ref, o_ref = rest

    x = x_ref[0]                                             # (Cin, H*W)

    # ---- shortcut: 1x1 conv (BN folded) == channel matmul; identity otherwise
    if has_projection:
        res = jnp.dot(wsc_ref[...], x,
                      preferred_element_type=jnp.float32) + bsc_ref[...]
    else:
        res = x

    # ---- conv1: 3x3 'same' (BN folded) as one im2col matmul, then PReLU ----
    p1 = _im2col_3x3(x, width)                               # (9*Cin, HW)
    y1 = jnp.dot(w1_ref[...], p1,
                 preferred_element_type=jnp.float32) + b1_ref[...]
    y1 = _prelu(y1, a1_ref[0])

    # ---- conv2: 3x3 'same' (BN folded), no activation ----
    p2 = _im2col_3x3(y1, width)                              # (9*Cout, HW)
    y2 = jnp.dot(w2_ref[...], p2,
                 preferred_element_type=jnp.float32) + b2_ref[...]

    # ---- residual add + final PReLU ----
    o_ref[0] = _prelu(y2 + res, aout_ref[0])


def block_forward(x_nchw, p):
    """Fused residual block.  x_nchw: (N, Cin, H, W) -> (N, Cout, H, W)."""
    x = x_nchw.astype(jnp.float32)
    n, cin, h, w = x.shape
    cout = p['b1'].shape[0]
    hw = h * w
    has_projection = 'wsc' in p

    # Free reshape (no transpose, no extra HBM pass): channel-major with the
    # whole spatial extent on the lane axis.
    x_flat = x.reshape(n, cin, hw)

    smem = pl.BlockSpec(memory_space=pltpu.MemorySpace.SMEM)
    cmap = lambda i: (0, 0)                                  # weights: load once

    in_specs = [
        pl.BlockSpec((1, cin, hw), lambda i: (i, 0, 0)),     # x: one image/step
        pl.BlockSpec((cout, 9 * cin), cmap),                 # w1 (im2col layout)
        pl.BlockSpec((cout, 1), cmap),                       # b1
        smem,                                                # PReLU alpha 1
        pl.BlockSpec((cout, 9 * cout), cmap),                # w2 (im2col layout)
        pl.BlockSpec((cout, 1), cmap),                       # b2
    ]
    args = [x_flat, p['w1m'], p['b1'], p['a1'], p['w2m'], p['b2']]
    if has_projection:
        in_specs += [pl.BlockSpec((cout, cin), cmap),        # wsc (1x1 conv)
                     pl.BlockSpec((cout, 1), cmap)]          # bsc
        args += [p['wsc'], p['bsc']]
    in_specs.append(smem)                                    # final PReLU alpha
    args.append(p['a_out'])

    kern = functools.partial(block_kernel, width=w,
                             has_projection=has_projection)
    out_flat = pl.pallas_call(
        kern,
        out_shape=jax.ShapeDtypeStruct((n, cout, hw), jnp.float32),
        grid=(n,),
        in_specs=in_specs,
        out_specs=pl.BlockSpec((1, cout, hw), lambda i: (i, 0, 0)),
        compiler_params=pltpu.CompilerParams(
            dimension_semantics=("parallel",),
            vmem_limit_bytes=32 * 1024 * 1024),
    )(*args)
    return out_flat.reshape(n, cout, h, w)


# ------------------------- parameter construction -------------------------

def fold_bn(w_oihw, b, gamma, beta, mean, var, eps=1e-5):
    """Fold eval-mode BatchNorm into the preceding conv (weights OIHW)."""
    scale = gamma / jnp.sqrt(var + eps)
    return w_oihw * scale[:, None, None, None], (b - mean) * scale + beta


def make_params(key, cin, cout):
    ks = jax.random.split(key, 20)

    def bn_params(k0, k1, k2, k3, c):
        gamma = 1.0 + 0.1 * jax.random.normal(k0, (c,), jnp.float32)
        beta = 0.1 * jax.random.normal(k1, (c,), jnp.float32)
        mean = 0.1 * jax.random.normal(k2, (c,), jnp.float32)
        var = 0.5 + 0.5 * jnp.abs(jax.random.normal(k3, (c,), jnp.float32))
        return gamma, beta, mean, var

    # conv1 (3x3, cin->cout, OIHW like PyTorch) + BN
    w1 = 0.2 * jax.random.normal(ks[0], (cout, cin, 3, 3), jnp.float32)
    b1 = 0.1 * jax.random.normal(ks[1], (cout,), jnp.float32)
    w1f, b1f = fold_bn(w1, b1, *bn_params(ks[2], ks[3], ks[4], ks[5], cout))

    # conv2 (3x3, cout->cout) + BN
    w2 = 0.2 * jax.random.normal(ks[6], (cout, cout, 3, 3), jnp.float32)
    b2 = 0.1 * jax.random.normal(ks[7], (cout,), jnp.float32)
    w2f, b2f = fold_bn(w2, b2, *bn_params(ks[8], ks[9], ks[10], ks[11], cout))

    # PReLU params: PyTorch default single shared parameter init to 0.25
    a1 = jnp.array([0.25], jnp.float32)
    a_out = jnp.array([0.25], jnp.float32)

    # im2col weight layout: w_mat[co, (dy*3+dx)*C + ci] = w[co, ci, dy, dx]
    w1m = jnp.transpose(w1f, (0, 2, 3, 1)).reshape(cout, 9 * cin)
    w2m = jnp.transpose(w2f, (0, 2, 3, 1)).reshape(cout, 9 * cout)

    kp = dict(w1m=w1m, b1=b1f.reshape(cout, 1), a1=a1,
              w2m=w2m, b2=b2f.reshape(cout, 1), a_out=a_out)
    rp = dict(w1=w1f, b1=b1f, w2=w2f, b2=b2f, a1=a1, a_out=a_out)

    if cin != cout:   # projection shortcut: 1x1 conv + BN
        wsc = 0.2 * jax.random.normal(ks[12], (cout, cin, 1, 1), jnp.float32)
        bsc = 0.1 * jax.random.normal(ks[13], (cout,), jnp.float32)
        wscf, bscf = fold_bn(wsc, bsc,
                             *bn_params(ks[14], ks[15], ks[16], ks[17], cout))
        kp['wsc'] = wscf.reshape(cout, cin)
        kp['bsc'] = bscf.reshape(cout, 1)
        rp['wsc'] = wscf
        rp['bsc'] = bscf
    return kp, rp


# ------------------------- plain-JAX reference -------------------------

def ref_forward(x_nchw, rp):
    x = x_nchw.astype(jnp.float32)

    def conv(x, w, b):
        y = jax.lax.conv_general_dilated(
            x, w, (1, 1), 'SAME',
            dimension_numbers=('NCHW', 'OIHW', 'NCHW'))
        return y + b[None, :, None, None]

    y1 = _prelu(conv(x, rp['w1'], rp['b1']), rp['a1'][0])
    y2 = conv(y1, rp['w2'], rp['b2'])
    res = conv(x, rp['wsc'], rp['bsc']) if 'wsc' in rp else x
    return _prelu(y2 + res, rp['a_out'][0])


if __name__ == "__main__":
    key = jax.random.PRNGKey(0)
    k_x, k_p = jax.random.split(key)

    N, Cin, Cout, H, W = 2, 4, 8, 16, 16
    x = jax.random.normal(k_x, (N, Cin, H, W), jnp.float32)   # PyTorch NCHW input

    kernel_params, ref_params = make_params(k_p, Cin, Cout)

    out = jax.block_until_ready(block_forward(x, kernel_params))
    ref = jax.block_until_ready(ref_forward(x, ref_params))

    assert out.shape == (N, Cout, H, W), out.shape
    np.testing.assert_allclose(np.asarray(out), np.asarray(ref),
                               rtol=1e-4, atol=1e-4)
    print("KERNEL_OK")
</pallas_src>

<mosaic_0001>
module attributes {stable_mosaic.version = 11 : i64} {
  func.func @block_kernel(%arg0: i32, %arg1: memref<1x4x256xf32, #tpu.memory_space<vmem>>, %arg2: memref<8x36xf32, #tpu.memory_space<vmem>>, %arg3: memref<8x1xf32, #tpu.memory_space<vmem>>, %arg4: memref<1xf32, #tpu.memory_space<smem>>, %arg5: memref<8x72xf32, #tpu.memory_space<vmem>>, %arg6: memref<8x1xf32, #tpu.memory_space<vmem>>, %arg7: memref<8x4xf32, #tpu.memory_space<vmem>>, %arg8: memref<8x1xf32, #tpu.memory_space<vmem>>, %arg9: memref<1xf32, #tpu.memory_space<smem>>, %arg10: memref<1x8x256xf32, #tpu.memory_space<vmem>>) attributes {dimension_semantics = [#tpu.dimension_semantics<parallel>], iteration_bounds = array<i64: 2>, scalar_prefetch = 0 : i64, scratch_operands = 0 : i64, tpu.core_type = #tpu.core_type<tc>, window_params = [{transform_indices = @transform_0, window_bounds = array<i64: 1, 4, 256>}, {pipeline_mode = #tpu.pipeline_mode<synchronous>, transform_indices = @transform_1, window_bounds = array<i64: 8, 36>}, {pipeline_mode = #tpu.pipeline_mode<synchronous>, transform_indices = @transform_2, window_bounds = array<i64: 8, 1>}, {transform_indices = @transform_3, window_bounds = array<i64: 1>}, {pipeline_mode = #tpu.pipeline_mode<synchronous>, transform_indices = @transform_4, window_bounds = array<i64: 8, 72>}, {pipeline_mode = #tpu.pipeline_mode<synchronous>, transform_indices = @transform_5, window_bounds = array<i64: 8, 1>}, {pipeline_mode = #tpu.pipeline_mode<synchronous>, transform_indices = @transform_6, window_bounds = array<i64: 8, 4>}, {pipeline_mode = #tpu.pipeline_mode<synchronous>, transform_indices = @transform_7, window_bounds = array<i64: 8, 1>}, {transform_indices = @transform_8, window_bounds = array<i64: 1>}, {transform_indices = @transform_9, window_bounds = array<i64: 1, 8, 256>}]} {
    %c0 = arith.constant 0 : index
    %c0_0 = arith.constant 0 : index
    %c0_1 = arith.constant 0 : index
    %0 = vector.load %arg1[%c0, %c0_0, %c0_1] : memref<1x4x256xf32, #tpu.memory_space<vmem>>, vector<1x4x256xf32>
    %1 = vector.shape_cast %0 : vector<1x4x256xf32> to vector<4x256xf32>
    %c0_2 = arith.constant 0 : index
    %c0_3 = arith.constant 0 : index
    %2 = vector.load %arg7[%c0_2, %c0_3] : memref<8x4xf32, #tpu.memory_space<vmem>>, vector<8x4xf32>
    %cst = arith.constant dense<0.000000e+00> : vector<8x256xf32>
    %3 = tpu.matmul %2, %1, %cst {dimension_numbers = #tpu.dot_dimension_numbers<[1], [0], [0], [1], [0, 0, 1, 1], [], []>} : vector<8x4xf32>, vector<4x256xf32>, vector<8x256xf32> -> vector<8x256xf32>
    %c0_4 = arith.constant 0 : index
    %c0_5 = arith.constant 0 : index
    %4 = vector.load %arg8[%c0_4, %c0_5] : memref<8x1xf32, #tpu.memory_space<vmem>>, vector<8x1xf32>
    %5 = vector.broadcast %4 : vector<8x1xf32> to vector<8x256xf32>
    %6 = arith.addf %3, %5 : vector<8x256xf32>
    %cst_6 = arith.constant 0.000000e+00 : f32
    %7 = vector.broadcast %cst_6 : f32 to vector<4x17xf32>
    %8 = tpu.concatenate %7, %1, %7 in 1 : vector<4x17xf32>, vector<4x256xf32>, vector<4x17xf32> -> vector<4x290xf32>
    %9 = tpu.iota {dimensions = array<i32: 1>} : vector<1x256xi32>
    %c16_i32 = arith.constant 16 : i32
    %c0_i32 = arith.constant 0 : i32
    %10 = arith.cmpi eq, %c16_i32, %c0_i32 : i32
    %c1_i32 = arith.constant 1 : i32
    %11 = arith.select %10, %c1_i32, %c16_i32 : i32
    %12 = vector.broadcast %11 : i32 to vector<1x256xi32>
    %13 = arith.remsi %9, %12 : vector<1x256xi32>
    %c0_i32_7 = arith.constant 0 : i32
    %14 = vector.broadcast %c0_i32_7 : i32 to vector<1x256xi32>
    %15 = arith.cmpi ne, %13, %14 : vector<1x256xi32>
    %c0_i32_8 = arith.constant 0 : i32
    %16 = vector.broadcast %c0_i32_8 : i32 to vector<1x256xi32>
    %17 = arith.cmpi slt, %13, %16 : vector<1x256xi32>
    %c0_i32_9 = arith.constant 0 : i32
    %18 = arith.cmpi slt, %11, %c0_i32_9 : i32
    %19 = vector.broadcast %18 : i1 to vector<1x256xi1>
    %20 = vector.broadcast %19 : vector<1x256xi1> to vector<1x256xi1>
    %21 = arith.xori %17, %20 : vector<1x256xi1>
    %22 = arith.andi %21, %15 : vector<1x256xi1>
    %23 = vector.broadcast %11 : i32 to vector<1x256xi32>
    %24 = arith.addi %13, %23 : vector<1x256xi32>
    %25 = arith.select %22, %24, %13 : vector<1x256xi1>, vector<1x256xi32>
    %c0_i32_10 = arith.constant 0 : i32
    %26 = vector.broadcast %c0_i32_10 : i32 to vector<1x256xi32>
    %27 = arith.cmpi eq, %25, %26 : vector<1x256xi32>
    %c15_i32 = arith.constant 15 : i32
    %28 = vector.broadcast %c15_i32 : i32 to vector<1x256xi32>
    %29 = arith.cmpi eq, %25, %28 : vector<1x256xi32>
    %30 = vector.extract_strided_slice %8 {offsets = [0, 0], sizes = [4, 256], strides = [1, 1]} : vector<4x290xf32> to vector<4x256xf32>
    %cst_11 = arith.constant 0.000000e+00 : f32
    %31 = vector.shape_cast %27 : vector<1x256xi1> to vector<1x256xi1>
    %32 = vector.broadcast %31 : vector<1x256xi1> to vector<4x256xi1>
    %33 = vector.broadcast %cst_11 : f32 to vector<4x256xf32>
    %34 = arith.select %32, %33, %30 : vector<4x256xi1>, vector<4x256xf32>
    %35 = vector.extract_strided_slice %8 {offsets = [0, 1], sizes = [4, 256], strides = [1, 1]} : vector<4x290xf32> to vector<4x256xf32>
    %36 = vector.extract_strided_slice %8 {offsets = [0, 2], sizes = [4, 256], strides = [1, 1]} : vector<4x290xf32> to vector<4x256xf32>
    %cst_12 = arith.constant 0.000000e+00 : f32
    %37 = vector.shape_cast %29 : vector<1x256xi1> to vector<1x256xi1>
    %38 = vector.broadcast %37 : vector<1x256xi1> to vector<4x256xi1>
    %39 = vector.broadcast %cst_12 : f32 to vector<4x256xf32>
    %40 = arith.select %38, %39, %36 : vector<4x256xi1>, vector<4x256xf32>
    %41 = vector.extract_strided_slice %8 {offsets = [0, 16], sizes = [4, 256], strides = [1, 1]} : vector<4x290xf32> to vector<4x256xf32>
    %cst_13 = arith.constant 0.000000e+00 : f32
    %42 = vector.shape_cast %27 : vector<1x256xi1> to vector<1x256xi1>
    %43 = vector.broadcast %42 : vector<1x256xi1> to vector<4x256xi1>
    %44 = vector.broadcast %cst_13 : f32 to vector<4x256xf32>
    %45 = arith.select %43, %44, %41 : vector<4x256xi1>, vector<4x256xf32>
    %46 = vector.extract_strided_slice %8 {offsets = [0, 17], sizes = [4, 256], strides = [1, 1]} : vector<4x290xf32> to vector<4x256xf32>
    %47 = vector.extract_strided_slice %8 {offsets = [0, 18], sizes = [4, 256], strides = [1, 1]} : vector<4x290xf32> to vector<4x256xf32>
    %cst_14 = arith.constant 0.000000e+00 : f32
    %48 = vector.shape_cast %29 : vector<1x256xi1> to vector<1x256xi1>
    %49 = vector.broadcast %48 : vector<1x256xi1> to vector<4x256xi1>
    %50 = vector.broadcast %cst_14 : f32 to vector<4x256xf32>
    %51 = arith.select %49, %50, %47 : vector<4x256xi1>, vector<4x256xf32>
    %52 = vector.extract_strided_slice %8 {offsets = [0, 32], sizes = [4, 256], strides = [1, 1]} : vector<4x290xf32> to vector<4x256xf32>
    %cst_15 = arith.constant 0.000000e+00 : f32
    %53 = vector.shape_cast %27 : vector<1x256xi1> to vector<1x256xi1>
    %54 = vector.broadcast %53 : vector<1x256xi1> to vector<4x256xi1>
    %55 = vector.broadcast %cst_15 : f32 to vector<4x256xf32>
    %56 = arith.select %54, %55, %52 : vector<4x256xi1>, vector<4x256xf32>
    %57 = vector.extract_strided_slice %8 {offsets = [0, 33], sizes = [4, 256], strides = [1, 1]} : vector<4x290xf32> to vector<4x256xf32>
    %58 = vector.extract_strided_slice %8 {offsets = [0, 34], sizes = [4, 256], strides = [1, 1]} : vector<4x290xf32> to vector<4x256xf32>
    %cst_16 = arith.constant 0.000000e+00 : f32
    %59 = vector.shape_cast %29 : vector<1x256xi1> to vector<1x256xi1>
    %60 = vector.broadcast %59 : vector<1x256xi1> to vector<4x256xi1>
    %61 = vector.broadcast %cst_16 : f32 to vector<4x256xf32>
    %62 = arith.select %60, %61, %58 : vector<4x256xi1>, vector<4x256xf32>
    %63 = tpu.concatenate %34, %35, %40, %45, %46, %51, %56, %57, %62 in 0 : vector<4x256xf32>, vector<4x256xf32>, vector<4x256xf32>, vector<4x256xf32>, vector<4x256xf32>, vector<4x256xf32>, vector<4x256xf32>, vector<4x256xf32>, vector<4x256xf32> -> vector<36x256xf32>
    %c0_17 = arith.constant 0 : index
    %c0_18 = arith.constant 0 : index
    %64 = vector.load %arg2[%c0_17, %c0_18] : memref<8x36xf32, #tpu.memory_space<vmem>>, vector<8x36xf32>
    %cst_19 = arith.constant dense<0.000000e+00> : vector<8x256xf32>
    %65 = tpu.matmul %64, %63, %cst_19 {dimension_numbers = #tpu.dot_dimension_numbers<[1], [0], [0], [1], [0, 0, 1, 1], [], []>} : vector<8x36xf32>, vector<36x256xf32>, vector<8x256xf32> -> vector<8x256xf32>
    %c0_20 = arith.constant 0 : index
    %c0_21 = arith.constant 0 : index
    %66 = vector.load %arg3[%c0_20, %c0_21] : memref<8x1xf32, #tpu.memory_space<vmem>>, vector<8x1xf32>
    %67 = vector.broadcast %66 : vector<8x1xf32> to vector<8x256xf32>
    %68 = arith.addf %65, %67 : vector<8x256xf32>
    %c0_22 = arith.constant 0 : index
    %69 = memref.load %arg4[%c0_22] : memref<1xf32, #tpu.memory_space<smem>>
    %cst_23 = arith.constant 0.000000e+00 : f32
    %70 = vector.broadcast %cst_23 : f32 to vector<8x256xf32>
    %71 = arith.maximumf %68, %70 : vector<8x256xf32>
    %cst_24 = arith.constant 0.000000e+00 : f32
    %72 = vector.broadcast %cst_24 : f32 to vector<8x256xf32>
    %73 = arith.minimumf %68, %72 : vector<8x256xf32>
    %74 = vector.broadcast %69 : f32 to vector<8x256xf32>
    %75 = arith.mulf %74, %73 : vector<8x256xf32>
    %76 = arith.addf %71, %75 : vector<8x256xf32>
    %cst_25 = arith.constant 0.000000e+00 : f32
    %77 = vector.broadcast %cst_25 : f32 to vector<8x17xf32>
    %78 = tpu.concatenate %77, %76, %77 in 1 : vector<8x17xf32>, vector<8x256xf32>, vector<8x17xf32> -> vector<8x290xf32>
    %79 = tpu.iota {dimensions = array<i32: 1>} : vector<1x256xi32>
    %c16_i32_26 = arith.constant 16 : i32
    %c0_i32_27 = arith.constant 0 : i32
    %80 = arith.cmpi eq, %c16_i32_26, %c0_i32_27 : i32
    %c1_i32_28 = arith.constant 1 : i32
    %81 = arith.select %80, %c1_i32_28, %c16_i32_26 : i32
    %82 = vector.broadcast %81 : i32 to vector<1x256xi32>
    %83 = arith.remsi %79, %82 : vector<1x256xi32>
    %c0_i32_29 = arith.constant 0 : i32
    %84 = vector.broadcast %c0_i32_29 : i32 to vector<1x256xi32>
    %85 = arith.cmpi ne, %83, %84 : vector<1x256xi32>
    %c0_i32_30 = arith.constant 0 : i32
    %86 = vector.broadcast %c0_i32_30 : i32 to vector<1x256xi32>
    %87 = arith.cmpi slt, %83, %86 : vector<1x256xi32>
    %c0_i32_31 = arith.constant 0 : i32
    %88 = arith.cmpi slt, %81, %c0_i32_31 : i32
    %89 = vector.broadcast %88 : i1 to vector<1x256xi1>
    %90 = vector.broadcast %89 : vector<1x256xi1> to vector<1x256xi1>
    %91 = arith.xori %87, %90 : vector<1x256xi1>
    %92 = arith.andi %91, %85 : vector<1x256xi1>
    %93 = vector.broadcast %81 : i32 to vector<1x256xi32>
    %94 = arith.addi %83, %93 : vector<1x256xi32>
    %95 = arith.select %92, %94, %83 : vector<1x256xi1>, vector<1x256xi32>
    %c0_i32_32 = arith.constant 0 : i32
    %96 = vector.broadcast %c0_i32_32 : i32 to vector<1x256xi32>
    %97 = arith.cmpi eq, %95, %96 : vector<1x256xi32>
    %c15_i32_33 = arith.constant 15 : i32
    %98 = vector.broadcast %c15_i32_33 : i32 to vector<1x256xi32>
    %99 = arith.cmpi eq, %95, %98 : vector<1x256xi32>
    %100 = vector.extract_strided_slice %78 {offsets = [0, 0], sizes = [8, 256], strides = [1, 1]} : vector<8x290xf32> to vector<8x256xf32>
    %cst_34 = arith.constant 0.000000e+00 : f32
    %101 = vector.shape_cast %97 : vector<1x256xi1> to vector<1x256xi1>
    %102 = vector.broadcast %101 : vector<1x256xi1> to vector<8x256xi1>
    %103 = vector.broadcast %cst_34 : f32 to vector<8x256xf32>
    %104 = arith.select %102, %103, %100 : vector<8x256xi1>, vector<8x256xf32>
    %105 = vector.extract_strided_slice %78 {offsets = [0, 1], sizes = [8, 256], strides = [1, 1]} : vector<8x290xf32> to vector<8x256xf32>
    %106 = vector.extract_strided_slice %78 {offsets = [0, 2], sizes = [8, 256], strides = [1, 1]} : vector<8x290xf32> to vector<8x256xf32>
    %cst_35 = arith.constant 0.000000e+00 : f32
    %107 = vector.shape_cast %99 : vector<1x256xi1> to vector<1x256xi1>
    %108 = vector.broadcast %107 : vector<1x256xi1> to vector<8x256xi1>
    %109 = vector.broadcast %cst_35 : f32 to vector<8x256xf32>
    %110 = arith.select %108, %109, %106 : vector<8x256xi1>, vector<8x256xf32>
    %111 = vector.extract_strided_slice %78 {offsets = [0, 16], sizes = [8, 256], strides = [1, 1]} : vector<8x290xf32> to vector<8x256xf32>
    %cst_36 = arith.constant 0.000000e+00 : f32
    %112 = vector.shape_cast %97 : vector<1x256xi1> to vector<1x256xi1>
    %113 = vector.broadcast %112 : vector<1x256xi1> to vector<8x256xi1>
    %114 = vector.broadcast %cst_36 : f32 to vector<8x256xf32>
    %115 = arith.select %113, %114, %111 : vector<8x256xi1>, vector<8x256xf32>
    %116 = vector.extract_strided_slice %78 {offsets = [0, 17], sizes = [8, 256], strides = [1, 1]} : vector<8x290xf32> to vector<8x256xf32>
    %117 = vector.extract_strided_slice %78 {offsets = [0, 18], sizes = [8, 256], strides = [1, 1]} : vector<8x290xf32> to vector<8x256xf32>
    %cst_37 = arith.constant 0.000000e+00 : f32
    %118 = vector.shape_cast %99 : vector<1x256xi1> to vector<1x256xi1>
    %119 = vector.broadcast %118 : vector<1x256xi1> to vector<8x256xi1>
    %120 = vector.broadcast %cst_37 : f32 to vector<8x256xf32>
    %121 = arith.select %119, %120, %117 : vector<8x256xi1>, vector<8x256xf32>
    %122 = vector.extract_strided_slice %78 {offsets = [0, 32], sizes = [8, 256], strides = [1, 1]} : vector<8x290xf32> to vector<8x256xf32>
    %cst_38 = arith.constant 0.000000e+00 : f32
    %123 = vector.shape_cast %97 : vector<1x256xi1> to vector<1x256xi1>
    %124 = vector.broadcast %123 : vector<1x256xi1> to vector<8x256xi1>
    %125 = vector.broadcast %cst_38 : f32 to vector<8x256xf32>
    %126 = arith.select %124, %125, %122 : vector<8x256xi1>, vector<8x256xf32>
    %127 = vector.extract_strided_slice %78 {offsets = [0, 33], sizes = [8, 256], strides = [1, 1]} : vector<8x290xf32> to vector<8x256xf32>
    %128 = vector.extract_strided_slice %78 {offsets = [0, 34], sizes = [8, 256], strides = [1, 1]} : vector<8x290xf32> to vector<8x256xf32>
    %cst_39 = arith.constant 0.000000e+00 : f32
    %129 = vector.shape_cast %99 : vector<1x256xi1> to vector<1x256xi1>
    %130 = vector.broadcast %129 : vector<1x256xi1> to vector<8x256xi1>
    %131 = vector.broadcast %cst_39 : f32 to vector<8x256xf32>
    %132 = arith.select %130, %131, %128 : vector<8x256xi1>, vector<8x256xf32>
    %133 = tpu.concatenate %104, %105, %110, %115, %116, %121, %126, %127, %132 in 0 : vector<8x256xf32>, vector<8x256xf32>, vector<8x256xf32>, vector<8x256xf32>, vector<8x256xf32>, vector<8x256xf32>, vector<8x256xf32>, vector<8x256xf32>, vector<8x256xf32> -> vector<72x256xf32>
    %c0_40 = arith.constant 0 : index
    %c0_41 = arith.constant 0 : index
    %134 = vector.load %arg5[%c0_40, %c0_41] : memref<8x72xf32, #tpu.memory_space<vmem>>, vector<8x72xf32>
    %cst_42 = arith.constant dense<0.000000e+00> : vector<8x256xf32>
    %135 = tpu.matmul %134, %133, %cst_42 {dimension_numbers = #tpu.dot_dimension_numbers<[1], [0], [0], [1], [0, 0, 1, 1], [], []>} : vector<8x72xf32>, vector<72x256xf32>, vector<8x256xf32> -> vector<8x256xf32>
    %c0_43 = arith.constant 0 : index
    %c0_44 = arith.constant 0 : index
    %136 = vector.load %arg6[%c0_43, %c0_44] : memref<8x1xf32, #tpu.memory_space<vmem>>, vector<8x1xf32>
    %137 = vector.broadcast %136 : vector<8x1xf32> to vector<8x256xf32>
    %138 = arith.addf %135, %137 : vector<8x256xf32>
    %139 = arith.addf %138, %6 : vector<8x256xf32>
    %c0_45 = arith.constant 0 : index
    %140 = memref.load %arg9[%c0_45] : memref<1xf32, #tpu.memory_space<smem>>
    %cst_46 = arith.constant 0.000000e+00 : f32
    %141 = vector.broadcast %cst_46 : f32 to vector<8x256xf32>
    %142 = arith.maximumf %139, %141 : vector<8x256xf32>
    %cst_47 = arith.constant 0.000000e+00 : f32
    %143 = vector.broadcast %cst_47 : f32 to vector<8x256xf32>
    %144 = arith.minimumf %139, %143 : vector<8x256xf32>
    %145 = vector.broadcast %140 : f32 to vector<8x256xf32>
    %146 = arith.mulf %145, %144 : vector<8x256xf32>
    %147 = arith.addf %142, %146 : vector<8x256xf32>
    %c0_48 = arith.constant 0 : index
    %c0_49 = arith.constant 0 : index
    %c0_50 = arith.constant 0 : index
    %148 = vector.load %arg10[%c0_48, %c0_49, %c0_50] : memref<1x8x256xf32, #tpu.memory_space<vmem>>, vector<1x8x256xf32>
    %149 = vector.shape_cast %148 : vector<1x8x256xf32> to vector<8x256xf32>
    %150 = vector.shape_cast %147 : vector<8x256xf32> to vector<1x8x256xf32>
    tpu.vector_store %arg10[%c0_48, %c0_49, %c0_50], %150 {strides = array<i32>} : memref<1x8x256xf32, #tpu.memory_space<vmem>>, vector<1x8x256xf32>,
    return
  }
  func.func @transform_0(%arg0: i32) -> (i32, i32, i32) {
    %c0_i32 = arith.constant 0 : i32
    %c0_i32_0 = arith.constant 0 : i32
    %c0_i32_1 = arith.constant 0 : i32
    return %arg0, %c0_i32, %c0_i32_0 : i32, i32, i32
  }
  func.func @transform_1(%arg0: i32) -> (i32, i32) {
    %c0_i32 = arith.constant 0 : i32
    %c0_i32_0 = arith.constant 0 : i32
    %c0_i32_1 = arith.constant 0 : i32
    return %c0_i32, %c0_i32_0 : i32, i32
  }
  func.func @transform_2(%arg0: i32) -> (i32, i32) {
    %c0_i32 = arith.constant 0 : i32
    %c0_i32_0 = arith.constant 0 : i32
    %c0_i32_1 = arith.constant 0 : i32
    return %c0_i32, %c0_i32_0 : i32, i32
  }
  func.func @transform_3(%arg0: i32) -> i32 {
    %c0_i32 = arith.constant 0 : i32
    %c0_i32_0 = arith.constant 0 : i32
    return %c0_i32 : i32
  }
  func.func @transform_4(%arg0: i32) -> (i32, i32) {
    %c0_i32 = arith.constant 0 : i32
    %c0_i32_0 = arith.constant 0 : i32
    %c0_i32_1 = arith.constant 0 : i32
    return %c0_i32, %c0_i32_0 : i32, i32
  }
  func.func @transform_5(%arg0: i32) -> (i32, i32) {
    %c0_i32 = arith.constant 0 : i32
    %c0_i32_0 = arith.constant 0 : i32
    %c0_i32_1 = arith.constant 0 : i32
    return %c0_i32, %c0_i32_0 : i32, i32
  }
  func.func @transform_6(%arg0: i32) -> (i32, i32) {
    %c0_i32 = arith.constant 0 : i32
    %c0_i32_0 = arith.constant 0 : i32
    %c0_i32_1 = arith.constant 0 : i32
    return %c0_i32, %c0_i32_0 : i32, i32
  }
  func.func @transform_7(%arg0: i32) -> (i32, i32) {
    %c0_i32 = arith.constant 0 : i32
    %c0_i32_0 = arith.constant 0 : i32
    %c0_i32_1 = arith.constant 0 : i32
    return %c0_i32, %c0_i32_0 : i32, i32
  }
  func.func @transform_8(%arg0: i32) -> i32 {
    %c0_i32 = arith.constant 0 : i32
    %c0_i32_0 = arith.constant 0 : i32
    return %c0_i32 : i32
  }
  func.func @transform_9(%arg0: i32) -> (i32, i32, i32) {
    %c0_i32 = arith.constant 0 : i32
    %c0_i32_0 = arith.constant 0 : i32
    %c0_i32_1 = arith.constant 0 : i32
    return %arg0, %c0_i32, %c0_i32_0 : i32, i32, i32
  }
}

</mosaic_0001>

<bundles_post_ra>
// kernel: tpu_custom_call.1
= control target key start
LH: loop header
LB: loop body
LE: loop exit
PB: predicated region body
PF: predicated region fallthrough
CT: control target
= control target key end

     0   :  { %s1638_s0 = inlined_call_operand.vmem [shape: f32[2,4,256], index: 0, kind: input, shape index: {}]   ;;  %s1639_s1 = inlined_call_operand.vmem [shape: f32[8,36], index: 1, kind: input, shape index: {}]   ;;  %s1640_s2 = inlined_call_operand.vmem [shape: f32[8,1], index: 2, kind: input, shape index: {}]   ;;  %s1641_s3 = inlined_call_operand.<no memory space> [shape: f32[1], index: 3, kind: input, shape index: {}]   ;;  %s1642_s4 = inlined_call_operand.vmem [shape: f32[8,72], index: 4, kind: input, shape index: {}]   ;;  %s1643_s5 = inlined_call_operand.vmem [shape: f32[8,1], index: 5, kind: input, shape index: {}]   ;;  %s1644_s6 = inlined_call_operand.vmem [shape: f32[8,4], index: 6, kind: input, shape index: {}]   ;;  %s1645_s7 = inlined_call_operand.vmem [shape: f32[8,1], index: 7, kind: input, shape index: {}]   ;;  %s1646_s8 = inlined_call_operand.<no memory space> [shape: f32[1], index: 8, kind: input, shape index: {}]   ;;  %s1647_s9 = inlined_call_operand.hbm [shape: f32[2,8,256], index: 9, kind: output, shape index: {}]  }
   0x1   :  { %14 = sst [smem:[#allocation2]] %s1641_s3 }
   0x2   :  { %15 = sst [smem:[#allocation3]] %s1646_s8 }
   0x3   :  { %16 = vsyncpa [#allocation5], 0 }
   0x4   :  { %18 = vsyncpa [#allocation5 + $0x1], 0  ;;  %s1312_s13 = smov 0   ;;  %s1314_s14 = smov 0  }
   0x5   :  { %s1316_s15 = smov 0   ;;  %s1318_s16 = smov 0  }
   0x6 LB: > { %s1333_s3 = sadd.s32 4294967295, %s1241_s16   ;;  %s972_s8 = sadd.s32 4294967294, %s1241_s16   ;;  %s1241_s16 = sphi %s1318_s16, %s1674_s16   ;;  %s1237_s15 = sphi %s1316_s15, %s1673_s15   ;;  %s1233_s14 = sphi %s1314_s14, %s1672_s14   ;;  %s1229_s13 = sphi %s1312_s13, %s1671_s13  }
   0x7   : > { %s1337_s17 = sadd.s32 1, %s1241_s16   ;;  %s225_s18 = sadd.s32 1, %s1237_s15 }
   0x8   : > { %s222_s19 = ssub.s32 %s1241_s16, %s1337_s17  ;;  %p235_p0 = scmp.ne.s32.totalorder %s1237_s15, %s1233_s14 }
   0x9   : > { %p223_p1 = scmp.eq.s32.totalorder %s222_s19, 0  ;;  %p236_p2 = scmp.eq.s32.totalorder %s1333_s3, 1 }
   0xa   : > { %p241_p3 = scmp.ne.s32.totalorder %s1233_s14, %s1229_s13  ;;  %p242_p4 = scmp.eq.s32.totalorder %s972_s8, 1 }
   0xb   : > { %s1348_s20 = scalar_select %p223_p1, %s1237_s15, %s225_s18  }
   0xc   : > { %p1350_p5 = por %p236_p2, %p235_p0  ;;  %p1354_p6 = por %p242_p4, %p241_p3 }
   0xd   : > { %p975_p7 = scmp.ge.s32.totalorder %s1241_s16, 1  ;;  %p292_p8 = scmp.lt.s32.totalorder %s1241_s16, 3 }
   0xf   : > { %p293_p9 = pnand %p975_p7, %p292_p8 }
  0x10   : > { %p328_p10 = scmp.lt.s32.totalorder (!%p293_p9), %s1333_s3, 1  ;;  %s1243_s28 = smov (!%p293_p9), 17   ;;  %vm427_vm0 = vcmask (!%p293_p9), 138240   ;;  %vm347_vm1 = vcmask (!%p293_p9), 1043456   ;;  %v1249_v9 = vmov (!%p293_p9), 0.0   ;;  %v334_v10 = vld [vmem:[%s1644_s6] sm:$0xff] (!%p293_p9)  ;;  %v434_v16 = vlaneseq (!%p293_p9) }
  0x11   : > { %296 = sbr.rel (%p293_p9) target bundleno = 1019 (0x3fb), region = 56  ;;  %s1244_s29 = smov (!%p293_p9), 112   ;;  %416 = vmatprep.mubr.f32.mxu1 (!%p293_p9), %v1249_v9  ;;  %vm343_vm2 = vcmask (!%p293_p9), 31744   ;;  %877 = vmatprep.mubr.f32.mxu0 (!%p293_p9), %v1249_v9  ;;  %v1252_v14 = vmov (!%p293_p9), 0   ;;  %v599_v15 = vld [vmem:[%s1640_s2] sm:$0xff] (!%p293_p9)  ;;  %vm483_vm5 = vcmask (!%p293_p9), 1031168  }
  0x12   : > { %s1245_s30 = smov (!%p293_p9), 126   ;;  %s1246_s10 = smov (!%p293_p9), 110   ;;  %1141 = vset.pattern.permute.xlu1 (!%p293_p9), %v1252_v14  ;;  %1177 = vset.pattern.permute.xlu0 (!%p293_p9), %v1252_v14  ;;  %v435_v18 = vand.u32 (!%p293_p9), 127, %v434_v16  ;;  %vm1649_vm7 = vcmask (!%p293_p9), 785408   ;;  %vm496_vm9 = vcmask (!%p293_p9), 916480   ;;  %vm509_vm10 = vcmask (!%p293_p9), 900096  }
  0x13   : > { %s1247_s11 = smov (!%p293_p9), 127   ;;  %s1248_s12 = smov (!%p293_p9), 96   ;;  %vm568_vm11 = vcmask (!%p293_p9), 908288   ;;  %vm551_vm12 = vcmask (!%p293_p9), 1039360   ;;  %vm1650_vm13 = vcmask (!%p293_p9), 777216   ;;  %vm1648_vm14 = vcmask (!%p293_p9), 769024  }
  0x14   : > { %s1250_s19 = smov (!%p293_p9), 111   ;;  %v436_v20 = vadd.s32 (!%p293_p9), 128, %v435_v18  ;;  %v441_v23 = vand.u32 (!%p293_p9), 15, %v435_v18  ;;  %vm605_vm15 = vcmask (!%p293_p9), 293888   ;;  %s686_s18 = sld [smem:[#allocation2]] (!%p293_p9) }
  0x15   : > { %s1016_s25 = sshll.u32 (!%p293_p9), %s1333_s3, 8 }
  0x16   : > { %v448_v24 = vand.u32 (!%p293_p9), 15, %v436_v20  ;;  %vm1409_vm3 = vcmp.eq.s32.totalorder (!%p293_p9), %v441_v23, 0  ;;  %vm1417_vm6 = vcmp.eq.s32.totalorder (!%p293_p9), %v441_v23, 15 }
  0x18   : > { %s329_s23 = scalar_select %p328_p10, %s1333_s3, 1  ;;  %vm1413_vm4 = vcmp.eq.s32.totalorder %v448_v24, 0  ;;  %vm1421_vm8 = vcmp.eq.s32.totalorder %v448_v24, 15 }
  0x1a   : > { %s1015_s24 = sshll.u32 %s329_s23, 3  ;;  %s1251_s23 = smov 95  }
  0x1b   : > { %s332_s27 = scalar_lea.vmem %s1638_s0, %s1015_s24  ;;  %s1253_s24 = smov 94  }
  0x1c   : > { %v333_v0 = vld [vmem:[%s332_s27] sm:$0xff] }
  0x1d   : > { %423 = vrot.lane.b32.xlu0 %v333_v0, %s1243_s28  ;;  %v342_v1 = vcombine.high %v333_v0, %v333_v0 }
  0x1f   : > { %979 = vmatprep.subr.msk.mxu1 %vm347_vm1, %v342_v1 }
  0x20   : > { %980 = vmatpush1.msk.msra.mxu1 %vm347_vm1, %v333_v0 }
  0x21   : > { %425 = vrot.lane.b32.xlu0 %v342_v1, %s1243_s28  ;;  %981 = vmatmul.mubr.msk.f32.vlgmr.msra.gmra.mrb[0].mxu1 %vm343_vm2, %v334_v10  ;;  %vm1254_vm2 = vmmov 1  }
  0x22   : > { %679 = vmatprep.mubr.f32.mxu1 %v1249_v9 }
  0x8f   : > { %v424_v2 = vpop.permute.xlu0 %423 }
  0x90   : > { %v1368_v3 = vsel %vm427_vm0, 0.0, %v424_v2 }
  0x91   : > { %490 = vrot.lane.b32.xlu1 %v1368_v3, %s1244_s29  ;;  %v542_v8 = vrot.slane %v1368_v3, 4  ;;  %v469_v36 = vsel %vm1409_vm3, 0.0, %v1368_v3 }
  0x93   : > { %v426_v4 = vpop.permute.xlu0 %425 }
  0x94   : > { %v1373_v5 = vsel %vm427_vm0, %v424_v2, %v426_v4  ;;  %v433_v6 = vsel %vm427_vm0, %v426_v4, 0.0 }
  0x95   : > { %477 = vrot.lane.b32.xlu1 %v1368_v3, %s1245_s30  ;;  %v1111_v7 = vpack.i.bf16 %v433_v6, %v1373_v5  ;;  %v543_v11 = vrot.slane %v1373_v5, 4  ;;  %v544_v12 = vrot.slane %v433_v6, 4  ;;  %v470_v35 = vsel %vm1413_vm4, 0.0, %v1373_v5 }
  0x97   : > { %1112 = vrot.lane.b32.xlu0 %v1111_v7, %s1245_s30  ;;  %v1131_v13 = vpack.i.bf16 %v544_v12, %v543_v11 }
  0x99   : > { %503 = vrot.lane.b32.xlu1 %v1368_v3, %s1246_s10 }
  0x9b   : > { %545 = vrot.lane.b32.xlu0 %v542_v8, %s1247_s11 }
  0x9d   : > { %516 = vrot.lane.b32.xlu1 %v1368_v3, %s1248_s12 }
  0x9f   : > { %1122 = vrot.lane.b32.xlu0 %v1111_v7, %s1248_s12 }
  0xa1   : > { %1107 = vrot.lane.b32.xlu1 %v1111_v7, %s1244_s29 }
  0xa3   : > { %1127 = vrot.lane.b32.xlu0 %v1111_v7, %s1250_s19 }
  0xa5   : > { %1117 = vrot.lane.b32.xlu1 %v1111_v7, %s1246_s10 }
  0xa7   : > { %1132 = vrot.lane.b32.xlu0 %v1131_v13, %s1247_s11 }
  0xa9   : > { %1137 = vrot.lane.b32.xlu1 %v1131_v13, %s1251_s23 }
  0xab   : > { %562 = vrot.lane.b32.xlu0 %v1368_v3, %s1250_s19 }
  0xad   : > { %579 = vrot.lane.b32.xlu1 %v542_v8, %s1251_s23 }
  0xaf   : > { %531 = vrot.lane.b32.xlu0 %v1373_v5, %s1253_s24 }
  0xb1   : > { %533 = vrot.lane.b32.xlu1 %v433_v6, %s1253_s24 }
  0xb3   : > { %529 = vrot.lane.b32.xlu0 %v1368_v3, %s1253_s24 }
  0xb5   : > { %602 = vperm.xlu1 %1141, %v599_v15  }
 0x103   : > { %v491_v17 = vpop.permute.xlu1 %490 }
 0x107   : > { %v478_v19 = vpop.permute.xlu1 %477 }
 0x109   : > { %v1113_v21 = vpop.permute.xlu0 %1112 }
 0x10a   : > { %v1114_v27 = vunpack.i.l.bf16 %v1113_v21  ;;  %v1115_v30 = vunpack.i.h.bf16 %v1113_v21 }
 0x10b   : > { %v504_v22 = vpop.permute.xlu1 %503 }
 0x10c   : > { %v484_v37 = vsel %vm483_vm5, %v478_v19, %v1114_v27  ;;  %v485_v40 = vsel %vm483_vm5, %v1114_v27, %v1115_v30 }
 0x10d   : > { %v546_v25 = vpop.permute.xlu0 %545  ;;  %v488_v48 = vsel %vm1417_vm6, 0.0, %v484_v37  ;;  %v489_v59 = vsel %vm1421_vm8, 0.0, %v485_v40  ;;  %v598_v40 = vld [vmem:[%s1639_s1] sm:$0xff] }
 0x10f   : > { %v517_v26 = vpop.permute.xlu1 %516 }
 0x111   : > { %v1123_v31 = vpop.permute.xlu0 %1122 }
 0x112   : > { %v1125_v41 = vunpack.i.h.bf16 %v1123_v31  ;;  %v1124_v42 = vunpack.i.l.bf16 %v1123_v31 }
 0x113   : > { %v1108_v34 = vpop.permute.xlu1 %1107 }
 0x114   : > { %v1110_v38 = vunpack.i.h.bf16 %v1108_v34  ;;  %v1109_v39 = vunpack.i.l.bf16 %v1108_v34  ;;  %v523_v56 = vsel %vm1649_vm7, %v517_v26, %v1124_v42  ;;  %v524_v57 = vsel %vm1649_vm7, %v1124_v42, %v1125_v41  ;;  %v1480_v41 = vpop.f32.mrb[0].mxu1 }
 0x115   : > { %v1128_v43 = vpop.permute.xlu0 %1127  ;;  %v528_v20 = vsel %vm1413_vm4, 0.0, %v524_v57  ;;  %v1482_v42 = vpop.f32.mrb[1].mxu1 }
 0x116   : > { %v497_v44 = vsel %vm496_vm9, %v491_v17, %v1109_v39  ;;  %v498_v45 = vsel %vm496_vm9, %v1109_v39, %v1110_v38  ;;  %v1130_v46 = vunpack.i.h.bf16 %v1128_v43  ;;  %v1129_v47 = vunpack.i.l.bf16 %v1128_v43 }
 0x117   : > { %v501_v49 = vsel %vm1409_vm3, 0.0, %v497_v44  ;;  %v502_v50 = vsel %vm1413_vm4, 0.0, %v498_v45  ;;  %v1118_v51 = vpop.permute.xlu1 %1117 }
 0x118   : > { %v558_v52 = vrot.slane %v501_v49, 4  ;;  %v559_v53 = vrot.slane %v502_v50, 4  ;;  %v1120_v54 = vunpack.i.h.bf16 %v1118_v51  ;;  %v1119_v55 = vunpack.i.l.bf16 %v1118_v51 }
 0x119   : > { %v1133_v58 = vpop.permute.xlu0 %1132  ;;  %v570_v60 = vsel %vm568_vm11, %v1129_v47, %v1130_v46 }
 0x11a   : > { %v510_v61 = vsel %vm509_vm10, %v504_v22, %v1119_v55  ;;  %v511_v62 = vsel %vm509_vm10, %v1119_v55, %v1120_v54  ;;  %v1135_v63 = vunpack.i.h.bf16 %v1133_v58  ;;  %v1134_v0 = vunpack.i.l.bf16 %v1133_v58 }
 0x11b   : > { %v514_v1 = vsel %vm1417_vm6, 0.0, %v510_v61  ;;  %v515_v2 = vsel %vm1421_vm8, 0.0, %v511_v62  ;;  %v1138_v3 = vpop.permute.xlu1 %1137  ;;  %v593_v4 = vsel %vm347_vm1, %v489_v59, %v559_v53  ;;  %v592_v5 = vsel %vm347_vm1, %v488_v48, %v558_v52 }
 0x11c   : > { %v575_v6 = vrot.slane %v514_v1, 4  ;;  %v576_v7 = vrot.slane %v515_v2, 4  ;;  %v552_v8 = vsel %vm551_vm12, %v546_v25, %v1134_v0  ;;  %v553_v9 = vsel %vm551_vm12, %v1134_v0, %v1135_v63  ;;  %v335_v63 = vld [vmem:[%s1645_s7] sm:$0xff] }
 0x11d   : > { %v1140_v10 = vunpack.i.h.bf16 %v1138_v3  ;;  %v1139_v11 = vunpack.i.l.bf16 %v1138_v3  ;;  %v563_v12 = vpop.permute.xlu0 %562  ;;  %v591_v13 = vsel %vm347_vm1, %v470_v35, %v553_v9  ;;  %v590_v14 = vsel %vm347_vm1, %v469_v36, %v552_v8  ;;  %v803_v0 = vld [vmem:[%s1643_s5] sm:$0xff] }
 0x11e   : > { %v569_v15 = vsel %vm568_vm11, %v563_v12, %v1129_v47  ;;  %v1017_v16 = vpack.c.bf16 %v593_v4, %v591_v13  ;;  %v1019_v17 = vpack.c.bf16 %v592_v5, %v590_v14  ;;  %v595_v18 = vsel %vm347_vm1, %v570_v60, %v576_v7 }
 0x11f   : > { %v580_v19 = vpop.permute.xlu1 %579  ;;  %v587_v21 = vsel %vm1650_vm13, %v1139_v11, %v1140_v10  ;;  %v527_v22 = vsel %vm1409_vm3, 0.0, %v523_v56  ;;  %v594_v25 = vsel %vm347_vm1, %v569_v15, %v575_v6  ;;  %v691_v47 = vstv %s686_s18 }
 0x120   : > { %v586_v23 = vsel %vm1650_vm13, %v580_v19, %v1139_v11  ;;  %1018 = vmatprep.subr.bf16.mxu1 %v1017_v16  ;;  %v597_v24 = vsel %vm347_vm1, %v528_v20, %v587_v21  ;;  %vm991_vm13 = vmneg %vm1417_vm6 }
 0x121   : > { %v596_v26 = vsel %vm347_vm1, %v527_v22, %v586_v23  ;;  %v532_v27 = vpop.permute.xlu0 %531  ;;  %1020 = vmatpush1.bf16.msra.mxu1 %v1019_v17  ;;  %v1021_v30 = vpack.c.bf16 %v597_v24, %v595_v18 }
 0x122   : > { %v1023_v31 = vpack.c.bf16 %v596_v26, %v594_v25 }
 0x123   : > { %1022 = vmatprep.subr.bf16.mxu1 %v1021_v30  ;;  %v534_v34 = vpop.permute.xlu1 %533 }
 0x124   : > { %v537_v35 = vsel %vm1648_vm14, %v532_v27, %v534_v34 }
 0x125   : > { %v541_v36 = vsel %vm1421_vm8, 0.0, %v537_v35  ;;  %v530_v37 = vpop.permute.xlu0 %529  ;;  %1024 = vmatpush1.bf16.msra.mxu1 %v1023_v31 }
 0x126   : > { %v536_v38 = vsel %vm1648_vm14, %v530_v37, %v532_v27  ;;  %982 = vmatprep.subr.msk.mxu1 %vm347_vm1, %v541_v36  ;;  %vm989_vm14 = vmneg %vm1421_vm8 }
 0x127   : > { %v540_v39 = vsel %vm1417_vm6, 0.0, %v536_v38 }
 0x129   : > { %983 = vmatpush1.msk.msra.mxu1 %vm347_vm1, %v540_v39  ;;  %vm987_vm1 = vmneg %vm1409_vm3 }
 0x12a   : > { %984 = vmatmul.mubr.msk.f32.vlgmr.msra.gmra.mrb[2].mxu1 %vm605_vm15, %v598_v40  ;;  %vm1532_vm7 = vmpackc.low %vm1254_vm2, %vm987_vm1 }
 0x12b   : > { %vm1038_vm3 = vmpackc.low %vm989_vm14, %vm1254_vm2 }
 0x134   : > { %v603_v43 = vpop.permute.xlu1 %602 }
 0x1fd   : > { %v681_v44 = vpop.f32.mrb[2].mxu1 }
 0x1fe   : > { %v682_v45 = vadd.f32 %v681_v44, %v603_v43  ;;  %v683_v46 = vpop.f32.mrb[3].mxu1 }
 0x1ff   : > { %v684_v48 = vadd.f32 %v683_v46, %v603_v43 }
 0x200   : > { %v689_v49 = vmin.f32 %v682_v45, 0.0  ;;  %v687_v51 = vmax.f32 %v682_v45, 0.0 }
 0x201   : > { %v690_v50 = vmin.f32 %v684_v48, 0.0  ;;  %v688_v53 = vmax.f32 %v684_v48, 0.0 }
 0x202   : > { %v692_v52 = vmul.f32 %v691_v47, %v689_v49 }
 0x203   : > { %v693_v54 = vmul.f32 %v691_v47, %v690_v50 }
 0x204   : > { %v694_v55 = vadd.f32 %v692_v52, %v687_v51 }
 0x205   : > { %v695_v56 = vadd.f32 %v693_v54, %v688_v53 }
 0x206   : > { %698 = vrot.lane.b32.xlu0 %v694_v55, %s1243_s28 }
 0x207   : > { %700 = vrot.lane.b32.xlu1 %v695_v56, %s1243_s28  ;;  %s1596_s28 = scalar_lea.hbm %s1647_s9, %s1016_s25 }
 0x278   : > { %v699_v57 = vpop.permute.xlu0 %698 }
 0x279   : > { %v706_v58 = vsel %vm427_vm0, 0.0, %v699_v57  ;;  %v701_v59 = vpop.permute.xlu1 %700 }
 0x27a   : > { %712 = vrot.lane.b32.xlu0 %v706_v58, %s1245_s30  ;;  %772 = vrot.lane.b32.xlu1 %v706_v58, %s1247_s11  ;;  %v702_v60 = vsel %vm427_vm0, %v699_v57, %v701_v59  ;;  %v707_v61 = vsel %vm427_vm0, %v701_v59, 0.0  ;;  %vm985_vm0 = vmneg %vm1413_vm4 }
 0x27b   : > { %v1152_v62 = vpack.i.bf16 %v707_v61, %v702_v60  ;;  %vm1520_vm15 = vmpackc.low %vm1254_vm2, %vm985_vm0 }
 0x27c   : > { %vm1041_vm4 = vmpackc.low %vm991_vm13, %vm1254_vm2 }
 0x27e   : > { %736 = vrot.lane.b32.xlu0 %v706_v58, %s1246_s10  ;;  %724 = vrot.lane.b32.xlu1 %v706_v58, %s1244_s29 }
 0x282   : > { %748 = vrot.lane.b32.xlu0 %v706_v58, %s1248_s12  ;;  %782 = vrot.lane.b32.xlu1 %v706_v58, %s1250_s19 }
 0x286   : > { %1153 = vrot.lane.b32.xlu1 %v1152_v62, %s1244_s29  ;;  %1143 = vrot.lane.b32.xlu0 %v1152_v62, %s1247_s11 }
 0x28a   : > { %1163 = vrot.lane.b32.xlu1 %v1152_v62, %s1250_s19  ;;  %1148 = vrot.lane.b32.xlu0 %v1152_v62, %s1245_s30  ;;  %s886_s19 = sld [smem:[#allocation3]]  ;;  %s1255_s30 = smov [#allocation4]  }
 0x28b   : > { %s1183_s11 = sshll.u32 %s1255_s30, 4  ;;  %s1184_s11 = int_to_ptr.vmem [resolvable:$false] %s1183_s11 }
 0x28e   : > { %1173 = vrot.lane.b32.xlu1 %v1152_v62, %s1251_s23  ;;  %1158 = vrot.lane.b32.xlu0 %v1152_v62, %s1246_s10  ;;  %s1185_s10 = scalar_lea.vmem %s1184_s11, 512 }
 0x292   : > { %792 = vrot.lane.b32.xlu1 %v706_v58, %s1251_s23  ;;  %1168 = vrot.lane.b32.xlu0 %v1152_v62, %s1248_s12  ;;  %v802_v62 = vld [vmem:[%s1642_s4] sm:$0xff]  ;;  %s325_s23 = sand.u32 1, %s1233_s14  }
 0x293   : > { %s899_s29 = scalar_lea.sflag [#allocation5], %s325_s23 }
 0x296   : > { %764 = vrot.lane.b32.xlu1 %v707_v61, %s1253_s24  ;;  %762 = vrot.lane.b32.xlu0 %v702_v60, %s1253_s24 }
 0x29a   : > { %338 = vperm.xlu1 %1141, %v335_v63   ;;  %760 = vrot.lane.b32.xlu0 %v706_v58, %s1253_s24  ;;  %s976_s24 = sshll.u32 %s325_s23, 4 }
 0x29b   : > { %s327_s26 = scalar_lea.vmem [#allocation4], %s976_s24 }
 0x29c   : > { %s913_s27 = sshll.u32 %s327_s26, 4  ;;  %s1598_s27 = int_to_ptr.vmem [resolvable:$true] %s913_s27 }
 0x29d   : > { %s1179_s3 = scalar_lea.vmem %s1598_s27, 256  ;;  %p1186_p0 = scmp.lt.s32.totalorder %s1598_s27, %s1184_s11 }
 0x29e   : > { %806 = vperm.xlu0 %1177, %v803_v0   ;;  %p1180_p11 = scmp.ne.s32.totalorder %s1598_s27, %s1179_s3  ;;  %p1187_p1 = scmp.lt.s32.totalorder %s1185_s10, %s1179_s3 }
 0x2a0   : > { %p1181_p12 = pnand %p1180_p11, %p1350_p5  ;;  %p1188_p2 = por %p1187_p1, %p1186_p0 }
 0x2a2   : > { %p1182_p13 = pneg %p1181_p12 }
 0x2a4   : > { %p1189_p3 = pnand %p1188_p2, %p1182_p13 }
 0x2ec   : > { %v713_v1 = vpop.permute.xlu0 %712  ;;  %v773_v2 = vpop.permute.xlu1 %772 }
 0x2f0   : > { %v737_v3 = vpop.permute.xlu0 %736  ;;  %v725_v4 = vpop.permute.xlu1 %724 }
 0x2f4   : > { %v749_v5 = vpop.permute.xlu0 %748  ;;  %v783_v6 = vpop.permute.xlu1 %782 }
 0x2f8   : > { %v1154_v7 = vpop.permute.xlu1 %1153  ;;  %v1144_v8 = vpop.permute.xlu0 %1143 }
 0x2f9   : > { %v1146_v9 = vunpack.i.h.bf16 %v1144_v8  ;;  %v1145_v10 = vunpack.i.l.bf16 %v1144_v8  ;;  %v1156_v12 = vunpack.i.h.bf16 %v1154_v7  ;;  %v1155_v13 = vunpack.i.l.bf16 %v1154_v7 }
 0x2fa   : > { %v891_v7 = vstv %s886_s19 }
 0x2fb   : > { %v779_v14 = vsel %vm551_vm12, %v1145_v10, %v1146_v9  ;;  %v778_v15 = vsel %vm551_vm12, %v773_v2, %v1145_v10  ;;  %v730_v25 = vsel %vm496_vm9, %v725_v4, %v1155_v13  ;;  %v731_v26 = vsel %vm496_vm9, %v1155_v13, %v1156_v12  ;;  %vm1032_vm12 = vmpackc.low %vm985_vm0, %vm989_vm14 }
 0x2fc   : > { %v1164_v16 = vpop.permute.xlu1 %1163  ;;  %v1149_v17 = vpop.permute.xlu0 %1148  ;;  %v1025_v18 = vpack.c.bf16 %v779_v14, %v702_v60  ;;  %v1028_v19 = vpack.c.bf16 %v778_v15, %v706_v58  ;;  %vm1665_vm9 = vcmask 777216  }
 0x2fd   : > { %v1151_v21 = vunpack.i.h.bf16 %v1149_v17  ;;  %v1150_v22 = vunpack.i.l.bf16 %v1149_v17  ;;  %v1166_v23 = vunpack.i.h.bf16 %v1164_v16  ;;  %v1165_v24 = vunpack.i.l.bf16 %v1164_v16 }
 0x2fe   : > { %1027 = vmatprep.subr.msk.bf16.mxu0 %vm1520_vm15, %v1025_v18 }
 0x2ff   : > { %v718_v27 = vsel %vm483_vm5, %v713_v1, %v1150_v22  ;;  %v719_v30 = vsel %vm483_vm5, %v1150_v22, %v1151_v21  ;;  %1030 = vmatpush1.bf16.msk.msra.mxu0 %vm1532_vm7, %v1028_v19  ;;  %vm1035_vm5 = vmpackc.low %vm987_vm1, %vm991_vm13  ;;  %v788_v29 = vsel %vm568_vm11, %v783_v6, %v1165_v24  ;;  %v789_v39 = vsel %vm568_vm11, %v1165_v24, %v1166_v23 }
 0x300   : > { %v1031_v31 = vpack.c.bf16 %v731_v26, %v719_v30  ;;  %v1034_v34 = vpack.c.bf16 %v730_v25, %v718_v27  ;;  %v1174_v35 = vpop.permute.xlu1 %1173  ;;  %v1159_v36 = vpop.permute.xlu0 %1158  ;;  %vm1667_vm11 = vcmask 785408   ;;  %vm1669_vm1 = vcmask 769024  }
 0x301   : > { %v1161_v37 = vunpack.i.h.bf16 %v1159_v36  ;;  %v1160_v38 = vunpack.i.l.bf16 %v1159_v36  ;;  %v1176_v40 = vunpack.i.h.bf16 %v1174_v35  ;;  %v1175_v43 = vunpack.i.l.bf16 %v1174_v35  ;;  %vm1668_vm0 = vmmov %vm1667_vm11 }
 0x302   : > { %1033 = vmatprep.subr.msk.bf16.mxu0 %vm1032_vm12, %v1031_v31  ;;  %vm1670_vm2 = vmmov %vm1669_vm1  ;;  %vm809_vm12 = vcmask 588800  }
 0x303   : > { %v742_v44 = vsel %vm509_vm10, %v737_v3, %v1160_v38  ;;  %v743_v45 = vsel %vm509_vm10, %v1160_v38, %v1161_v37  ;;  %1036 = vmatpush1.bf16.msk.msra.mxu0 %vm1035_vm5, %v1034_v34  ;;  %v799_v51 = vsel %vm1665_vm9, %v1175_v43, %v1176_v40  ;;  %vm1666_vm10 = vmmov %vm1665_vm9 }
 0x304   : > { %v1037_v28 = vpack.c.bf16 %v743_v45, %v789_v39  ;;  %v1040_v46 = vpack.c.bf16 %v742_v44, %v788_v29  ;;  %v793_v47 = vpop.permute.xlu1 %792  ;;  %v1169_v48 = vpop.permute.xlu0 %1168 }
 0x305   : > { %v1171_v49 = vunpack.i.h.bf16 %v1169_v48  ;;  %v1170_v50 = vunpack.i.l.bf16 %v1169_v48  ;;  %v798_v52 = vsel %vm1666_vm10, %v793_v47, %v1175_v43 }
 0x306   : > { %1039 = vmatprep.subr.msk.bf16.mxu0 %vm1038_vm3, %v1037_v28 }
 0x307   : > { %v754_v53 = vsel %vm1667_vm11, %v749_v5, %v1170_v50  ;;  %v755_v54 = vsel %vm1668_vm0, %v1170_v50, %v1171_v49  ;;  %1042 = vmatpush1.bf16.msk.msra.mxu0 %vm1041_vm4, %v1040_v46 }
 0x308   : > { %v1043_v55 = vpack.c.bf16 %v799_v51, %v755_v54  ;;  %v1046_v56 = vpack.c.bf16 %v798_v52, %v754_v53  ;;  %v765_v57 = vpop.permute.xlu1 %764  ;;  %v763_v58 = vpop.permute.xlu0 %762 }
 0x309   : > { %v767_v59 = vsel %vm1669_vm1, %v763_v58, %v765_v57 }
 0x30a   : > { %1045 = vmatprep.subr.msk.bf16.mxu0 %vm1520_vm15, %v1043_v55 }
 0x30b   : > { %1048 = vmatpush1.bf16.msk.msra.mxu0 %vm1532_vm7, %v1046_v56 }
 0x30c   : > { %v761_v60 = vpop.permute.xlu0 %760  ;;  %1006 = vmatprep.subr.msk.mxu0 %vm989_vm14, %v767_v59 }
 0x30d   : > { %v766_v61 = vsel %vm1670_vm2, %v761_v60, %v763_v58 }
 0x30f   : > { %1008 = vmatpush1.msk.msra.mxu0 %vm991_vm13, %v766_v61 }
 0x310   : > { %1009 = vmatmul.mubr.msk.f32.vlgmr.msra.gmra.mrb[0].mxu0 %vm809_vm12, %v802_v62 }
 0x319   : > { %v339_v63 = vpop.permute.xlu1 %338 }
 0x31a   : > { %v419_v33 = vadd.f32 %v1480_v41, %v339_v63  ;;  %v421_v1 = vadd.f32 %v1482_v42, %v339_v63 }
 0x31d   : > { %v807_v0 = vpop.permute.xlu0 %806 }
 0x31e   : > { %v1050_v2 = vadd.f32 %v807_v0, %v419_v33  ;;  %v1053_v3 = vadd.f32 %v807_v0, %v421_v1 }
 0x3e3   : > { %v879_v4 = vpop.f32.mrb[0].mxu0 }
 0x3e4   : > { %v1051_v5 = vadd.f32 %v1050_v2, %v879_v4  ;;  %v881_v6 = vpop.f32.mrb[1].mxu0 }
 0x3e5   : > { %v1054_v32 = vadd.f32 %v1053_v3, %v881_v6 }
 0x3e6   : > { %v889_v8 = vmin.f32 %v1051_v5, 0.0  ;;  %v887_v10 = vmax.f32 %v1051_v5, 0.0 }
 0x3e7   : > { %v890_v9 = vmin.f32 %v1054_v32, 0.0  ;;  %v888_v12 = vmax.f32 %v1054_v32, 0.0 }
 0x3e8   : > { %v892_v11 = vmul.f32 %v891_v7, %v889_v8 }
 0x3e9   : > { %v893_v41 = vmul.f32 %v891_v7, %v890_v9 }
 0x3ea   : > { %v894_v13 = vadd.f32 %v892_v11, %v887_v10 }
 0x3eb   : > { %v895_v42 = vadd.f32 %v893_v41, %v888_v12 }
 0x3ec   : > { %896 = vst [vmem:[%s327_s26] sm:$0xff] %v894_v13 }
 0x3ed   : > { %897 = vst [vmem:[%s327_s26 + $0x8] sm:$0xff] %v895_v42 }
 0x3ee   : > { %1192 = shalt.err (!%p1189_p3)
}
 0x3ef   : > { %s1193_s12 = scalar_lea.hbm %s1596_s28, 256  ;;  %s1197_s24 = scalar_lea.hbm %s1647_s9, 512 }
 0x3f0   : > { %p1194_p4 = scmp.ne.s32.totalorder %s1596_s28, %s1193_s12  ;;  %p1198_p9 = scmp.lt.u32.totalorder %s1596_s28, %s1647_s9 }
 0x3f1   : > { %p1199_p10 = scmp.lt.u32.totalorder %s1197_s24, %s1193_s12  ;;  %p1201_p12 = scmp.lt.u32.totalorder %s1193_s12, %s1596_s28 }
 0x3f2   : > { %p1195_p7 = pnand %p1194_p4, %p1350_p5 }
 0x3f3   : > { %p1200_p11 = por %p1199_p10, %p1198_p9 }
 0x3f4   : > { %p1196_p8 = pneg %p1195_p7 }
 0x3f5   : > { %p1202_p13 = por %p1201_p12, %p1200_p11 }
 0x3f7   : > { %p1203_p0 = pnand %p1202_p13, %p1196_p8 }
 0x3f9   : > { %1206 = shalt.err (!%p1203_p0)
}
 0x3fa   : > { %1055 = dma.vmem_to_hbm [thread:$0]  (%p1350_p5), %s1598_s27, 256, %s1596_s28, %s899_s29  }
 0x3fb PF: > { %p1061_p1 = scmp.ge.s32.totalorder %s1241_s16, 2  ;;  %s925_s8 = sand.u32 1, %s1229_s13  }
 0x3fc   : > { %s926_s18 = scalar_lea.sflag [#allocation5], %s925_s8 }
 0x3fd   : > { %p1058_p2 = pnand %p1061_p1, %p1354_p6 }
 0x3ff   : > { %1224 = dma.done.wait (!%p1058_p2), %s926_s18, 256  }
 0x400   : > { %1226 = vsyncadd (!%p1058_p2), %s926_s18, 4294967040  ;;  %p21_p3 = scmp.ge.s32.totalorder %s1337_s17, 4   ;;  %s1671_s13 = smov %s1233_s14 }
 0x401   : > { %s1672_s14 = smov %s1237_s15  ;;  %s1673_s15 = smov %s1348_s20 }
 0x402   : > { %s1674_s16 = smov %s1337_s17  ;;  %23 = sbr.rel (!%p21_p3) target bundleno = 6 (0x6), region = 91 }
 0x409   :  { %931 = vsyncpa [#allocation5], 1 }
 0x40a   :  { %933 = vsyncpa [#allocation5 + $0x1], 1 }

</bundles_post_ra>
